<compile_context>
chip_gen: v7x
topology: tpu7x:2x2x1
jax: 0.10.0
libtpu: 0.0.40
codegen_flags: <defaults>
</compile_context>

<pallas_src>
import jax
import jax.numpy as jnp
from jax.experimental import pallas as pl
from jax.experimental.pallas import tpu as pltpu

_LANES = 512          # lane-dense column width (multiple of 128)
_SUBLANES = 8         # sublane granularity for f32
_MAX_TILE_ROWS = 2048  # (2048, 512) f32 tile = 4 MiB; 4x (dbl-buffered in+out) = 16 MiB


def _round_up(x: int, m: int) -> int:
    return ((x + m - 1) // m) * m


def _controller_kernel(y_ref, u_ref):
    # u = -y^2 - 1 + 0.5*y, factored as y*(0.5 - y) - 1  (sub, mul, sub).
    y = y_ref[...]
    u_ref[...] = y * (0.5 - y) - 1.0


def nonlinear_controller(y: jax.Array) -> jax.Array:
    """y: (batch, 1, K) -> u: (batch, 1, K).  Pure elementwise op."""
    assert y.ndim == 3 and y.shape[1] == 1
    b, one, k = y.shape
    n = b * k

    # Present a lane-dense 2-D slab: cols multiple of 128, rows multiple of 8.
    cols = _LANES
    rows = _round_up(pl.cdiv(n, cols), _SUBLANES)
    tile_rows = min(rows, _MAX_TILE_ROWS)
    rows = _round_up(rows, tile_rows)           # make grid divide evenly
    padded = rows * cols

    flat = jnp.ravel(y)
    if padded != n:
        flat = jnp.pad(flat, (0, padded - n))   # padding computes to -1, sliced off below
    y2d = flat.reshape(rows, cols)

    out2d = pl.pallas_call(
        _controller_kernel,
        out_shape=jax.ShapeDtypeStruct((rows, cols), y.dtype),
        grid_spec=pltpu.PrefetchScalarGridSpec(
            num_scalar_prefetch=0,
            grid=(rows // tile_rows,),
            in_specs=[pl.BlockSpec((tile_rows, cols), lambda i: (i, 0))],
            out_specs=pl.BlockSpec((tile_rows, cols), lambda i: (i, 0)),
        ),
        compiler_params=pltpu.CompilerParams(
            dimension_semantics=("parallel",)),
        # The padded 2-D input is a wrapper-local intermediate, dead after the
        # call -> let the output overwrite its buffer.
        input_output_aliases={0: 0},
    )(y2d)

    return out2d.reshape(padded)[:n].reshape(b, one, k)


if __name__ == "__main__":
    key = jax.random.PRNGKey(0)

    # Module-sized example: NonLinearController(input_K_dim=16, output_K_dim=16).
    batch, input_K_dim = 2, 16
    y_small = jax.random.normal(key, (batch, 1, input_K_dim), dtype=jnp.float32)
    u_small = nonlinear_controller(y_small)
    jax.block_until_ready(u_small)
    ref_small = -y_small ** 2 - 1.0 + 0.5 * y_small
    assert u_small.shape == (batch, 1, input_K_dim)
    assert jnp.allclose(u_small, ref_small, atol=1e-6), "small-shape mismatch vs reference"

    # Larger shape to exercise the tiled / multi-row-block path.
    y_big = jax.random.normal(jax.random.PRNGKey(1), (4, 1, 4096), dtype=jnp.float32)
    u_big = nonlinear_controller(y_big)
    jax.block_until_ready(u_big)
    ref_big = -y_big ** 2 - 1.0 + 0.5 * y_big
    assert jnp.allclose(u_big, ref_big, atol=1e-6), "large-shape mismatch vs reference"

    print("KERNEL_OK")
</pallas_src>

<mosaic_0001>
module attributes {stable_mosaic.version = 11 : i64} {
  func.func @_controller_kernel(%arg0: i32, %arg1: memref<8x512xf32, #tpu.memory_space<vmem>>, %arg2: memref<8x512xf32, #tpu.memory_space<vmem>>) attributes {dimension_semantics = [#tpu.dimension_semantics<parallel>], iteration_bounds = array<i64: 1>, scalar_prefetch = 0 : i64, scratch_operands = 0 : i64, tpu.core_type = #tpu.core_type<tc>, window_params = [{transform_indices = @transform_0, window_bounds = array<i64: 8, 512>}, {transform_indices = @transform_1, window_bounds = array<i64: 8, 512>}]} {
    %c0 = arith.constant 0 : index
    %c0_0 = arith.constant 0 : index
    %0 = vector.load %arg1[%c0, %c0_0] : memref<8x512xf32, #tpu.memory_space<vmem>>, vector<8x512xf32>
    %cst = arith.constant 5.000000e-01 : f32
    %1 = vector.broadcast %cst : f32 to vector<8x512xf32>
    %2 = arith.subf %1, %0 : vector<8x512xf32>
    %3 = arith.mulf %0, %2 : vector<8x512xf32>
    %cst_1 = arith.constant 1.000000e+00 : f32
    %4 = vector.broadcast %cst_1 : f32 to vector<8x512xf32>
    %5 = arith.subf %3, %4 : vector<8x512xf32>
    %c0_2 = arith.constant 0 : index
    %c0_3 = arith.constant 0 : index
    %6 = vector.load %arg2[%c0_2, %c0_3] : memref<8x512xf32, #tpu.memory_space<vmem>>, vector<8x512xf32>
    tpu.vector_store %arg2[%c0_2, %c0_3], %5 {strides = array<i32>} : memref<8x512xf32, #tpu.memory_space<vmem>>, vector<8x512xf32>,
    return
  }
  func.func @transform_0(%arg0: i32) -> (i32, i32) {
    %c0_i32 = arith.constant 0 : i32
    %c0_i32_0 = arith.constant 0 : i32
    return %arg0, %c0_i32 : i32, i32
  }
  func.func @transform_1(%arg0: i32) -> (i32, i32) {
    %c0_i32 = arith.constant 0 : i32
    %c0_i32_0 = arith.constant 0 : i32
    return %arg0, %c0_i32 : i32, i32
  }
}

</mosaic_0001>

<bundles_post_ra>
// kernel: tpu_custom_call.1
= control target key start
LH: loop header
LB: loop body
LE: loop exit
PB: predicated region body
PF: predicated region fallthrough
CT: control target
= control target key end

     0   :  { %6 = vsyncpa [#allocation3], 0  ;;  %s146_s0 = inlined_call_operand.hbm [shape: f32[8,512], index: 0, kind: input, shape index: {}, may-alias: {0,1}]   ;;  %s147_s1 = inlined_call_operand.hbm [shape: f32[8,512], index: 1, kind: output, shape index: {}, may-alias: {0,1}]  }
   0x1   :  { %7 = vsyncpa [#allocation4], 0  ;;  %s110_s6 = smov [#allocation2]   ;;  %s62_s10 = scalar_lea.hbm %s146_s0, 512 }
   0x2   :  { %s14_s7 = sshll.u32 %s110_s6, 4  ;;  %p63_p0 = scmp.ne.s32.totalorder %s146_s0, %s62_s10  ;;  %s15_s7 = int_to_ptr.vmem [resolvable:$true] %s14_s7 }
   0x3   :  { %p66_p1 = scmp.lt.u32.totalorder %s62_s10, %s146_s0 }
   0x5   :  { %p68_p2 = pnand %p66_p1, %p63_p0 }
   0x7   :  { %71 = shalt.err (!%p68_p2)
}
   0x8   :  { %s72_s15 = scalar_lea.vmem %s15_s7, 512  ;;  %p77_p4 = scmp.lt.s32.totalorder %s15_s7, %s15_s7 }
   0x9   :  { %p73_p3 = scmp.ne.s32.totalorder %s15_s7, %s72_s15  ;;  %p78_p5 = scmp.lt.s32.totalorder %s72_s15, %s72_s15 }
   0xb   :  { %p79_p6 = por %p78_p5, %p77_p4 }
   0xd   :  { %p80_p7 = pnand %p79_p6, %p73_p3 }
   0xf   :  { %83 = shalt.err (!%p80_p7)
}
  0x10   :  { %17 = dma.hbm_to_vmem [thread:$0]  %s146_s0, 512, %s15_s7, [#allocation3]  }
  0x11   :  { %106 = dma.done.wait [#allocation3], 512  }
  0x12   :  { %107 = vsyncadd [#allocation3], 4294966784  ;;  %v21_v0 = vld [vmem:[#allocation2] sm:$0xff]  ;;  %v22_v1 = vld [vmem:[#allocation2 + $0x8] sm:$0xff]  ;;  %s111_s18 = smov [#allocation5]  }
  0x13   :  { %v23_v2 = vld [vmem:[#allocation2 + $0x10] sm:$0xff]  ;;  %v25_v3 = vsub.f32 0.5, %v21_v0  ;;  %v26_v4 = vsub.f32 0.5, %v22_v1  ;;  %v24_v6 = vld [vmem:[#allocation2 + $0x18] sm:$0xff]  ;;  %s47_s19 = sshll.u32 %s111_s18, 4  ;;  %s48_s19 = int_to_ptr.vmem [resolvable:$true] %s47_s19 }
  0x14   :  { %v27_v5 = vsub.f32 0.5, %v23_v2  ;;  %v28_v7 = vsub.f32 0.5, %v24_v6  ;;  %s84_s0 = scalar_lea.vmem %s48_s19, 512  ;;  %p89_p9 = scmp.lt.s32.totalorder %s48_s19, %s48_s19 }
  0x15   :  { %v29_v8 = vmul.f32 %v25_v3, %v21_v0  ;;  %v30_v9 = vmul.f32 %v26_v4, %v22_v1  ;;  %p85_p8 = scmp.ne.s32.totalorder %s48_s19, %s84_s0  ;;  %p90_p10 = scmp.lt.s32.totalorder %s84_s0, %s84_s0 }
  0x16   :  { %v31_v10 = vmul.f32 %v27_v5, %v23_v2  ;;  %v32_v11 = vmul.f32 %v28_v7, %v24_v6 }
  0x17   :  { %v56_v12 = vadd.f32 -1.0, %v29_v8  ;;  %v57_v13 = vadd.f32 -1.0, %v30_v9  ;;  %p91_p11 = por %p90_p10, %p89_p9 }
  0x18   :  { %v58_v14 = vadd.f32 -1.0, %v31_v10  ;;  %v59_v15 = vadd.f32 -1.0, %v32_v11 }
  0x19   :  { %37 = vst [vmem:[#allocation5] sm:$0xff] %v56_v12  ;;  %38 = vst [vmem:[#allocation5 + $0x8] sm:$0xff] %v57_v13  ;;  %p92_p12 = pnand %p91_p11, %p85_p8 }
  0x1a   :  { %39 = vst [vmem:[#allocation5 + $0x10] sm:$0xff] %v58_v14  ;;  %40 = vst [vmem:[#allocation5 + $0x18] sm:$0xff] %v59_v15 }
  0x1b   :  { %95 = shalt.err (!%p92_p12)
}
  0x1c   :  { %s96_s22 = scalar_lea.hbm %s147_s1, 512 }
  0x1d   :  { %p97_p13 = scmp.ne.s32.totalorder %s147_s1, %s96_s22  ;;  %p100_p0 = scmp.lt.u32.totalorder %s96_s22, %s147_s1 }
  0x1f   :  { %p102_p1 = pnand %p100_p0, %p97_p13 }
  0x21   :  { %105 = shalt.err (!%p102_p1)
}
  0x22   :  { %50 = dma.vmem_to_hbm [thread:$0]  %s48_s19, 512, %s147_s1, [#allocation4]  }
  0x23   :  { %108 = dma.done.wait [#allocation4], 512  }
  0x24   :  { %109 = vsyncadd [#allocation4], 4294966784 }
  0x25   :  { %54 = vsyncpa [#allocation3], 1 }
  0x26   :  { %55 = vsyncpa [#allocation4], 1 }

</bundles_post_ra>
